<compile_context>
chip_gen: v6e
topology: v6e:2x2x1
jax: 0.10.0
libtpu: 0.0.40
codegen_flags: <defaults>
</compile_context>

<pallas_src>
import functools

import jax
import jax.numpy as jnp
from jax.experimental import pallas as pl
from jax.experimental.pallas import tpu as pltpu

LANE = 128
SUBLANE = 8

TILE_BYTES = 4 * 1024 * 1024     # per-input bytes streamed per grid step
CHUNK_BYTES = 256 * 1024         # live row-chunk processed per inner iteration
VMEM_LIMIT_BYTES = 32 * 1024 * 1024


def _sublane_multiple(dtype):
    # Minimum second-to-last tile dim: f32 -> 8, bf16 -> 16, int8/fp8 -> 32.
    itemsize = jnp.dtype(dtype).itemsize
    return (4 * SUBLANE) // max(1, min(4, itemsize))


def _num_tc_splits():
    """2 on dual-TensorCore chips (v7x), else 1."""
    try:
        kind = jax.devices()[0].device_kind.lower()
    except Exception:
        return 1
    return 2 if ("v7" in kind or "7x" in kind) else 1


def _rmse_partial_kernel(yhat_ref, y_ref, out_ref, *,
                         tile_rows, chunk_rows, steps_per_split,
                         rows_valid, needs_mask):
    c = pl.program_id(0)   # TensorCore split axis ("parallel")
    i = pl.program_id(1)   # reduction step within the split ("arbitrary")

    @pl.when(i == 0)
    def _():
        out_ref[...] = jnp.zeros_like(out_ref)

    block = c * steps_per_split + i          # logical block id
    n_chunks = tile_rows // chunk_rows
    groups = chunk_rows // SUBLANE

    def accumulate(masked):
        def body(j, carry):
            r0 = pl.multiple_of(j * chunk_rows, chunk_rows)
            diff = (yhat_ref[pl.ds(r0, chunk_rows), :].astype(jnp.float32)
                    - y_ref[pl.ds(r0, chunk_rows), :].astype(jnp.float32))
            d2 = diff * diff
            if masked:
                # Only partial / overhang blocks take this path (pl.when below),
                # so the iota/compare/select never taxes the steady-state steps.
                row_ids = (block * tile_rows + j * chunk_rows
                           + jax.lax.broadcasted_iota(
                               jnp.int32, (chunk_rows, LANE), 0))
                d2 = jnp.where(row_ids < rows_valid, d2, 0.0)
            # vreg-shaped partial-sum accumulation: elementwise VPU adds only.
            out_ref[...] += d2.reshape(groups, SUBLANE, LANE).sum(axis=0)
            return carry
        jax.lax.fori_loop(0, n_chunks, body, 0, unroll=True)

    if needs_mask:
        tile_is_full = (block + 1) * tile_rows <= rows_valid

        @pl.when(tile_is_full)
        def _():
            accumulate(False)

        @pl.when(jnp.logical_not(tile_is_full))
        def _():
            accumulate(True)
    else:
        accumulate(False)


def rmse_loss(yhat, y):
    assert yhat.shape == y.shape, "yhat and y must have the same shape"
    n_true = yhat.size

    yhat_flat = jnp.ravel(yhat)
    y_flat = jnp.ravel(y)

    # Dtype-aware alignment (correct minimum tiles for f32 / bf16 / int8).
    itemsize = max(jnp.dtype(yhat.dtype).itemsize, jnp.dtype(y.dtype).itemsize)
    sub_mult = max(_sublane_multiple(yhat.dtype), _sublane_multiple(y.dtype))
    align_elems = sub_mult * LANE
    aligned = (n_true // align_elems) * align_elems

    # Remainder (< align_elems elements): plain JAX instead of padding both
    # full inputs (avoids an extra HBM read+write of each input).
    if aligned < n_true:
        ty = yhat_flat[aligned:].astype(jnp.float32)
        tt = y_flat[aligned:].astype(jnp.float32)
        tail_sse = jnp.sum((ty - tt) * (ty - tt))
    else:
        tail_sse = jnp.float32(0.0)

    if aligned == 0:
        return jnp.sqrt(tail_sse / jnp.float32(n_true))

    # Aligned bulk.  Reshape is a free bitcast when the input is already aligned
    # (the common case).  For unaligned inputs the prefix slice may still
    # materialize a copy.
    # TODO(synk): manual-DMA path (memory_space=pl.ANY) over the original 1-D
    # buffer to avoid the prefix-slice copy for unaligned sizes, if it matters.
    rows = aligned // LANE                     # multiple of sub_mult
    yhat2d = yhat_flat[:aligned].reshape(rows, LANE)
    y2d = y_flat[:aligned].reshape(rows, LANE)

    # Byte-budgeted, dtype-aware tile sizing.
    rows_per_chunk = max(sub_mult, CHUNK_BYTES // (LANE * itemsize))
    rows_per_tile = max(rows_per_chunk, TILE_BYTES // (LANE * itemsize))
    if rows <= rows_per_chunk:
        chunk_rows = rows
        tile_rows = rows
    else:
        chunk_rows = rows_per_chunk
        tile_rows = min(rows_per_tile, (rows // chunk_rows) * chunk_rows)

    num_splits = _num_tc_splits()
    nblocks = pl.cdiv(rows, tile_rows)
    if nblocks < num_splits:
        num_splits = 1                          # tiny input: skip wasted split
    steps_per_split = pl.cdiv(nblocks, num_splits)
    needs_mask = num_splits * steps_per_split * tile_rows > rows

    def in_map(c, i):
        # Clamp: a logical block past the end (grid overhang) re-reads the last
        # in-bounds block; the in-kernel mask zeroes its contribution.
        return (jnp.minimum(c * steps_per_split + i, nblocks - 1), 0)

    # TODO(synk): on v7x, verify in a profile that the leading "parallel" axis
    # actually lands the two splits on both TensorCores; if not, switch that
    # axis to pltpu.CORE_PARALLEL.  (Buffered(3) on the input specs is the next
    # tunable to sweep; default double-buffering kept here.)
    partials = pl.pallas_call(
        functools.partial(
            _rmse_partial_kernel,
            tile_rows=tile_rows,
            chunk_rows=chunk_rows,
            steps_per_split=steps_per_split,
            rows_valid=rows,
            needs_mask=needs_mask,
        ),
        out_shape=jax.ShapeDtypeStruct((num_splits * SUBLANE, LANE), jnp.float32),
        grid_spec=pltpu.PrefetchScalarGridSpec(
            num_scalar_prefetch=0,
            grid=(num_splits, steps_per_split),
            in_specs=[
                pl.BlockSpec((tile_rows, LANE), in_map),
                pl.BlockSpec((tile_rows, LANE), in_map),
            ],
            out_specs=pl.BlockSpec((SUBLANE, LANE), lambda c, i: (c, 0)),
        ),
        compiler_params=pltpu.CompilerParams(
            dimension_semantics=("parallel", "arbitrary"),
            vmem_limit_bytes=VMEM_LIMIT_BYTES),
    )(yhat2d, y2d)

    # Final tiny cross-lane reduce + divide + sqrt in the wrapper.
    sse = jnp.sum(partials) + tail_sse
    return jnp.sqrt(sse / jnp.float32(n_true))


if __name__ == "__main__":
    key = jax.random.PRNGKey(0)
    rmse = jax.jit(rmse_loss)

    def check(shape, rtol):
        k1, k2 = jax.random.split(jax.random.fold_in(key, hash(shape) & 0xFFFF))
        yhat = jax.random.normal(k1, shape, dtype=jnp.float32)
        y = jax.random.normal(k2, shape, dtype=jnp.float32)
        out = rmse(yhat, y)
        jax.block_until_ready(out)
        ref = jnp.sqrt(jnp.mean((yhat - y) ** 2))
        assert jnp.allclose(out, ref, rtol=rtol, atol=1e-6), (shape, out, ref)

    # Primary small case (aligned, single block).
    check((2, 4, 16, 16), rtol=1e-5)
    # Unaligned size: exercises the plain-JAX remainder path.
    check((3, 700), rtol=1e-5)
    # Multi-block with a partial trailing block: exercises the masked path.
    check((9000, 128), rtol=1e-4)

    print("KERNEL_OK")
</pallas_src>

<mosaic_0001>
module attributes {stable_mosaic.version = 11 : i64} {
  func.func @_rmse_partial_kernel(%arg0: i32, %arg1: i32, %arg2: memref<16x128xf32, #tpu.memory_space<vmem>>, %arg3: memref<16x128xf32, #tpu.memory_space<vmem>>, %arg4: memref<8x128xf32, #tpu.memory_space<vmem>>) attributes {dimension_semantics = [#tpu.dimension_semantics<parallel>, #tpu.dimension_semantics<arbitrary>], iteration_bounds = array<i64: 1, 1>, scalar_prefetch = 0 : i64, scratch_operands = 0 : i64, tpu.core_type = #tpu.core_type<tc>, window_params = [{transform_indices = @transform_0, window_bounds = array<i64: 16, 128>}, {transform_indices = @transform_1, window_bounds = array<i64: 16, 128>}, {transform_indices = @transform_2, window_bounds = array<i64: 8, 128>}]} {
    %c0_i32 = arith.constant 0 : i32
    %0 = arith.cmpi eq, %arg1, %c0_i32 : i32
    %1 = arith.extui %0 : i1 to i32
    %c0_i32_0 = arith.constant 0 : i32
    %2 = arith.cmpi ne, %1, %c0_i32_0 : i32
    scf.if %2 {
      %cst_7 = arith.constant 0.000000e+00 : f32
      %16 = vector.broadcast %cst_7 : f32 to vector<8x128xf32>
      %c0_8 = arith.constant 0 : index
      %c0_9 = arith.constant 0 : index
      %17 = vector.load %arg4[%c0_8, %c0_9] : memref<8x128xf32, #tpu.memory_space<vmem>>, vector<8x128xf32>
      tpu.vector_store %arg4[%c0_8, %c0_9], %16 {strides = array<i32>} : memref<8x128xf32, #tpu.memory_space<vmem>>, vector<8x128xf32>,
    } else {
    }
    %c0_i32_1 = arith.constant 0 : i32
    %c16_i32 = arith.constant 16 : i32
    %3 = arith.muli %c0_i32_1, %c16_i32 : i32
    %4 = tpu.assume_multiple %3, 16 : i32
    %5 = arith.index_cast %4 : i32 to index
    %c0 = arith.constant 0 : index
    %6 = vector.load %arg2[%5, %c0] : memref<16x128xf32, #tpu.memory_space<vmem>>, vector<16x128xf32>
    %7 = arith.index_cast %4 : i32 to index
    %c0_2 = arith.constant 0 : index
    %8 = vector.load %arg3[%7, %c0_2] : memref<16x128xf32, #tpu.memory_space<vmem>>, vector<16x128xf32>
    %9 = arith.subf %6, %8 : vector<16x128xf32>
    %10 = arith.mulf %9, %9 : vector<16x128xf32>
    %c0_3 = arith.constant 0 : index
    %c0_4 = arith.constant 0 : index
    %11 = vector.load %arg4[%c0_3, %c0_4] : memref<8x128xf32, #tpu.memory_space<vmem>>, vector<8x128xf32>
    %12 = vector.shape_cast %10 : vector<16x128xf32> to vector<2x8x128xf32>
    %cst = arith.constant dense<0.000000e+00> : vector<8x128xf32>
    %13 = vector.multi_reduction <add>, %12, %cst [0] : vector<2x8x128xf32> to vector<8x128xf32>
    %14 = arith.addf %11, %13 : vector<8x128xf32>
    %c0_5 = arith.constant 0 : index
    %c0_6 = arith.constant 0 : index
    %15 = vector.load %arg4[%c0_5, %c0_6] : memref<8x128xf32, #tpu.memory_space<vmem>>, vector<8x128xf32>
    tpu.vector_store %arg4[%c0_5, %c0_6], %14 {strides = array<i32>} : memref<8x128xf32, #tpu.memory_space<vmem>>, vector<8x128xf32>,
    %c1_i32 = arith.constant 1 : i32
    return
  }
  func.func @transform_0(%arg0: i32, %arg1: i32) -> (i32, i32) {
    %c1_i32 = arith.constant 1 : i32
    %0 = arith.muli %arg0, %c1_i32 : i32
    %1 = arith.addi %0, %arg1 : i32
    %c0_i32 = arith.constant 0 : i32
    %2 = arith.minsi %1, %c0_i32 : i32
    %c0_i32_0 = arith.constant 0 : i32
    %c0_i32_1 = arith.constant 0 : i32
    return %2, %c0_i32_0 : i32, i32
  }
  func.func @transform_1(%arg0: i32, %arg1: i32) -> (i32, i32) {
    %c1_i32 = arith.constant 1 : i32
    %0 = arith.muli %arg0, %c1_i32 : i32
    %1 = arith.addi %0, %arg1 : i32
    %c0_i32 = arith.constant 0 : i32
    %2 = arith.minsi %1, %c0_i32 : i32
    %c0_i32_0 = arith.constant 0 : i32
    %c0_i32_1 = arith.constant 0 : i32
    return %2, %c0_i32_0 : i32, i32
  }
  func.func @transform_2(%arg0: i32, %arg1: i32) -> (i32, i32) {
    %c0_i32 = arith.constant 0 : i32
    %c0_i32_0 = arith.constant 0 : i32
    return %arg0, %c0_i32 : i32, i32
  }
}

</mosaic_0001>

<bundles_post_ra>
// kernel: rmse_loss.1
= control target key start
LH: loop header
LB: loop body
LE: loop exit
PB: predicated region body
PF: predicated region fallthrough
CT: control target
= control target key end

     0   :  { %s139_s0 = inlined_call_operand.vmem [shape: f32[16,128], index: 0, kind: input, shape index: {}]   ;;  %s140_s1 = inlined_call_operand.vmem [shape: f32[16,128], index: 1, kind: input, shape index: {}]   ;;  %s141_s2 = inlined_call_operand.vmem [shape: f32[8,128], index: 2, kind: output, shape index: {}]  }
   0x1   :  { %v80_v0 = vld [vmem:[%s139_s0] sm:$0xff]  ;;  %v81_v1 = vld [vmem:[%s139_s0 + $0x8] sm:$0xff] }
   0x2   :  { %v82_v2 = vld [vmem:[%s140_s1] sm:$0xff]  ;;  %v83_v3 = vld [vmem:[%s140_s1 + $0x8] sm:$0xff] }
   0x3   :  { %v84_v4 = vsub.f32 %v80_v0, %v82_v2  ;;  %v85_v5 = vsub.f32 %v81_v1, %v83_v3 }
   0x5   :  { %v86_v6 = vmul.f32 %v84_v4, %v84_v4  ;;  %v87_v7 = vmul.f32 %v85_v5, %v85_v5 }
   0x7   :  { %v89_v8 = vadd.f32 %v87_v7, %v86_v6 }
   0x9   :  { %91 = vst [vmem:[%s141_s2] sm:$0xff] %v89_v8 }

</bundles_post_ra>
